<compile_context>
chip_gen: v7x
topology: tpu7x:2x2x1
jax: 0.10.0
libtpu: 0.0.40
codegen_flags: <defaults>
</compile_context>

<pallas_src>
import functools

import jax
import jax.numpy as jnp
from jax.experimental import pallas as pl
from jax.experimental.pallas import tpu as pltpu

_LANES = 128


def _layernorm_kernel(x_ref, g_ref, b_ref, o_ref, *, eps, inv_c):
    # x_ref / o_ref: (Nb, C, St, 128)     g_ref / b_ref: (1, C, 1, 1)
    x = x_ref[...].astype(jnp.float32)

    # Per-(n, spatial) statistics over the channel axis.  C is a non-minor
    # "slab" axis here, so the reduce is C plain VPU adds over (St,128) vregs.
    # Two-pass form for numerical accuracy (no extra HBM traffic).
    mean = jnp.sum(x, axis=1, keepdims=True) * inv_c          # (Nb, 1, St, 128)
    xc = x - mean
    var = jnp.sum(xc * xc, axis=1, keepdims=True) * inv_c     # (Nb, 1, St, 128)
    inv = 1.0 / (jnp.sqrt(var) + eps)                         # torch: /(std + eps)

    # Affine params loaded once per grid step (hoisted broadcast).
    g = g_ref[...].astype(jnp.float32)                        # (1, C, 1, 1)
    b = b_ref[...].astype(jnp.float32)
    o_ref[...] = (xc * inv * g + b).astype(o_ref.dtype)


def _choose_tiling(N, C, S, f32_tile_budget):
    """Pick (Nb, St, S_pad) for x blocks of shape (Nb, C, St, 128).

    S = number of 128-lane spatial slabs.  The budget bounds the f32 working
    set of ONE tile (the kernel computes in f32); that is >= the HBM-side
    per-buffer size, and Pallas double-buffers both the input and the output
    spec, so total VMEM ~ (2 + 2) * tile + ~3 * tile of f32 temporaries ->
    ~<8 MiB at the 1 MiB default: safe on v5e (16 MiB default scoped VMEM),
    v6e, and v7x (64 MiB physical VMEM).
    """
    # TODO(synk): for extremely large C (C*8*128*4 > budget) the minimum
    # spatially-tiled block still exceeds the budget; tiling C as well would
    # need a two-stage reduction and is not implemented.
    slab_f32_bytes = C * _LANES * 4
    st_budget = max(1, f32_tile_budget // slab_f32_bytes)     # slabs/step, Nb=1

    if S <= st_budget:
        # Whole spatial extent fits in one tile per batch element.
        if N == 1 and S >= 16:
            # Split spatially so a 'parallel' axis has >= 2 blocks
            # (keeps v7x's second TensorCore busy for single-image inference).
            St = pl.cdiv(pl.cdiv(S, 2), 8) * 8
            S_pad = pl.cdiv(S, St) * St
            return 1, St, S_pad
        St, S_pad = S, S
        # Pack batch elements per step to amortize the ~0.35us per-step
        # pipeline overhead, but keep >= 2 grid blocks when N >= 2 (megacore).
        Nb = min(N, max(1, st_budget // max(S, 1)))
        if N >= 2:
            Nb = min(Nb, max(1, N // 2))
        while N % Nb:
            Nb -= 1
        return Nb, St, S_pad

    # Tile the spatial axis; St must be a multiple of 8 (sublane tiling rule).
    St = max(8, (st_budget // 8) * 8)
    S_pad = pl.cdiv(S, St) * St
    return 1, St, S_pad


def layernorm_forward(x, g, b, *, eps=1e-5, f32_tile_budget=1 << 20):
    """x: (N, C, H, W), any float dtype.  g, b broadcastable to (1, C, 1, 1)."""
    N, C, H, W = x.shape
    hw = H * W
    S = pl.cdiv(hw, _LANES)
    Nb, St, S_pad = _choose_tiling(N, C, S, f32_tile_budget)
    hw_pad = S_pad * _LANES

    x3 = x.reshape(N, C, hw)                 # free contiguous view of NCHW
    if hw_pad != hw:
        # Pad-and-crop keeps the last dim a full 128 lanes (unmasked vst) and
        # bounds the block size even for non-aligned feature maps.
        x3 = jnp.pad(x3, ((0, 0), (0, 0), (0, hw_pad - hw)))
    x4 = x3.reshape(N, C, S_pad, _LANES)

    g4 = jnp.asarray(g).reshape(1, C, 1, 1)
    b4 = jnp.asarray(b).reshape(1, C, 1, 1)

    grid = (N // Nb, S_pad // St)
    kernel = functools.partial(_layernorm_kernel, eps=eps, inv_c=1.0 / C)

    out4 = pl.pallas_call(
        kernel,
        out_shape=jax.ShapeDtypeStruct((N, C, S_pad, _LANES), x.dtype),
        grid=grid,
        in_specs=[
            pl.BlockSpec((Nb, C, St, _LANES), lambda n, s: (n, 0, s, 0)),
            pl.BlockSpec((1, C, 1, 1), lambda n, s: (0, 0, 0, 0)),
            pl.BlockSpec((1, C, 1, 1), lambda n, s: (0, 0, 0, 0)),
        ],
        out_specs=pl.BlockSpec((Nb, C, St, _LANES), lambda n, s: (n, 0, s, 0)),
        compiler_params=pltpu.CompilerParams(
            dimension_semantics=("parallel", "parallel")),
    )(x4, g4, b4)

    out = out4.reshape(N, C, hw_pad)
    if hw_pad != hw:
        out = out[:, :, :hw]
    return out.reshape(N, C, H, W)


def layernorm_ref(x, g, b, *, eps=1e-5):
    """Pure-JAX reference, faithful translation of the PyTorch forward (f32)."""
    xf = x.astype(jnp.float32)
    mean = jnp.mean(xf, axis=1, keepdims=True)
    var = jnp.mean(jnp.square(xf - mean), axis=1, keepdims=True)
    std = jnp.sqrt(var)
    g4 = jnp.asarray(g).reshape(1, -1, 1, 1).astype(jnp.float32)
    b4 = jnp.asarray(b).reshape(1, -1, 1, 1).astype(jnp.float32)
    return (xf - mean) / (std + eps) * g4 + b4


if __name__ == "__main__":
    # Small shapes consistent with LayerNorm(dim=4) applied to NCHW feature maps.
    N, C, H, W = 2, 4, 16, 16
    eps = 1e-5

    key = jax.random.PRNGKey(0)
    kx, kg, kb = jax.random.split(key, 3)

    x = jax.random.normal(kx, (N, C, H, W), dtype=jnp.float32)
    # Module init is g=1, b=0; perturb slightly so the affine path is exercised.
    g = 1.0 + 0.1 * jax.random.normal(kg, (1, C, 1, 1), dtype=jnp.float32)
    b = 0.1 * jax.random.normal(kb, (1, C, 1, 1), dtype=jnp.float32)

    # f32 I/O path.
    out = jax.block_until_ready(layernorm_forward(x, g, b, eps=eps))
    ref = layernorm_ref(x, g, b, eps=eps)
    assert out.shape == (N, C, H, W)
    assert jnp.allclose(out, ref, atol=1e-5, rtol=1e-5), "f32 mismatch vs reference"

    # bf16 I/O path (f32 accumulation inside the kernel).
    x_bf = x.astype(jnp.bfloat16)
    out_bf = jax.block_until_ready(layernorm_forward(x_bf, g, b, eps=eps))
    ref_bf = layernorm_ref(x_bf.astype(jnp.float32), g, b, eps=eps)
    assert out_bf.dtype == jnp.bfloat16
    assert jnp.allclose(out_bf.astype(jnp.float32), ref_bf, atol=5e-2, rtol=5e-2), \
        "bf16 mismatch vs reference"

    print("KERNEL_OK")
</pallas_src>

<mosaic_0001>
module attributes {stable_mosaic.version = 11 : i64} {
  func.func @_layernorm_kernel(%arg0: i32, %arg1: i32, %arg2: memref<1x4x2x128xf32, #tpu.memory_space<vmem>>, %arg3: memref<1x4x1x1xf32, #tpu.memory_space<vmem>>, %arg4: memref<1x4x1x1xf32, #tpu.memory_space<vmem>>, %arg5: memref<1x4x2x128xf32, #tpu.memory_space<vmem>>) attributes {dimension_semantics = [#tpu.dimension_semantics<parallel>, #tpu.dimension_semantics<parallel>], iteration_bounds = array<i64: 2, 1>, scalar_prefetch = 0 : i64, scratch_operands = 0 : i64, tpu.core_type = #tpu.core_type<tc>, window_params = [{transform_indices = @transform_0, window_bounds = array<i64: 1, 4, 2, 128>}, {pipeline_mode = #tpu.pipeline_mode<synchronous>, transform_indices = @transform_1, window_bounds = array<i64: 1, 4, 1, 1>}, {pipeline_mode = #tpu.pipeline_mode<synchronous>, transform_indices = @transform_2, window_bounds = array<i64: 1, 4, 1, 1>}, {transform_indices = @transform_3, window_bounds = array<i64: 1, 4, 2, 128>}]} {
    %c0 = arith.constant 0 : index
    %c0_0 = arith.constant 0 : index
    %c0_1 = arith.constant 0 : index
    %c0_2 = arith.constant 0 : index
    %0 = vector.load %arg2[%c0, %c0_0, %c0_1, %c0_2] : memref<1x4x2x128xf32, #tpu.memory_space<vmem>>, vector<1x4x2x128xf32>
    %cst = arith.constant dense<0.000000e+00> : vector<1x2x128xf32>
    %1 = vector.multi_reduction <add>, %0, %cst [1] : vector<1x4x2x128xf32> to vector<1x2x128xf32>
    %2 = vector.shape_cast %1 : vector<1x2x128xf32> to vector<1x1x2x128xf32>
    %cst_3 = arith.constant 2.500000e-01 : f32
    %3 = vector.broadcast %cst_3 : f32 to vector<1x1x2x128xf32>
    %4 = arith.mulf %2, %3 : vector<1x1x2x128xf32>
    %5 = vector.broadcast %4 : vector<1x1x2x128xf32> to vector<1x4x2x128xf32>
    %6 = arith.subf %0, %5 : vector<1x4x2x128xf32>
    %7 = arith.mulf %6, %6 : vector<1x4x2x128xf32>
    %cst_4 = arith.constant dense<0.000000e+00> : vector<1x2x128xf32>
    %8 = vector.multi_reduction <add>, %7, %cst_4 [1] : vector<1x4x2x128xf32> to vector<1x2x128xf32>
    %9 = vector.shape_cast %8 : vector<1x2x128xf32> to vector<1x1x2x128xf32>
    %cst_5 = arith.constant 2.500000e-01 : f32
    %10 = vector.broadcast %cst_5 : f32 to vector<1x1x2x128xf32>
    %11 = arith.mulf %9, %10 : vector<1x1x2x128xf32>
    %12 = math.sqrt %11 : vector<1x1x2x128xf32>
    %cst_6 = arith.constant 9.99999974E-6 : f32
    %13 = vector.broadcast %cst_6 : f32 to vector<1x1x2x128xf32>
    %14 = arith.addf %12, %13 : vector<1x1x2x128xf32>
    %cst_7 = arith.constant 1.000000e+00 : f32
    %15 = vector.broadcast %cst_7 : f32 to vector<1x1x2x128xf32>
    %16 = arith.divf %15, %14 : vector<1x1x2x128xf32>
    %c0_8 = arith.constant 0 : index
    %c0_9 = arith.constant 0 : index
    %c0_10 = arith.constant 0 : index
    %c0_11 = arith.constant 0 : index
    %17 = vector.load %arg3[%c0_8, %c0_9, %c0_10, %c0_11] : memref<1x4x1x1xf32, #tpu.memory_space<vmem>>, vector<1x4x1x1xf32>
    %c0_12 = arith.constant 0 : index
    %c0_13 = arith.constant 0 : index
    %c0_14 = arith.constant 0 : index
    %c0_15 = arith.constant 0 : index
    %18 = vector.load %arg4[%c0_12, %c0_13, %c0_14, %c0_15] : memref<1x4x1x1xf32, #tpu.memory_space<vmem>>, vector<1x4x1x1xf32>
    %19 = vector.broadcast %16 : vector<1x1x2x128xf32> to vector<1x4x2x128xf32>
    %20 = arith.mulf %6, %19 : vector<1x4x2x128xf32>
    %21 = vector.broadcast %17 : vector<1x4x1x1xf32> to vector<1x4x2x128xf32>
    %22 = arith.mulf %20, %21 : vector<1x4x2x128xf32>
    %23 = vector.broadcast %18 : vector<1x4x1x1xf32> to vector<1x4x2x128xf32>
    %24 = arith.addf %22, %23 : vector<1x4x2x128xf32>
    %c0_16 = arith.constant 0 : index
    %c0_17 = arith.constant 0 : index
    %c0_18 = arith.constant 0 : index
    %c0_19 = arith.constant 0 : index
    %25 = vector.load %arg5[%c0_16, %c0_17, %c0_18, %c0_19] : memref<1x4x2x128xf32, #tpu.memory_space<vmem>>, vector<1x4x2x128xf32>
    tpu.vector_store %arg5[%c0_16, %c0_17, %c0_18, %c0_19], %24 {strides = array<i32>} : memref<1x4x2x128xf32, #tpu.memory_space<vmem>>, vector<1x4x2x128xf32>,
    return
  }
  func.func @transform_0(%arg0: i32, %arg1: i32) -> (i32, i32, i32, i32) {
    %c0_i32 = arith.constant 0 : i32
    %c0_i32_0 = arith.constant 0 : i32
    %c0_i32_1 = arith.constant 0 : i32
    return %arg0, %c0_i32, %arg1, %c0_i32_0 : i32, i32, i32, i32
  }
  func.func @transform_1(%arg0: i32, %arg1: i32) -> (i32, i32, i32, i32) {
    %c0_i32 = arith.constant 0 : i32
    %c0_i32_0 = arith.constant 0 : i32
    %c0_i32_1 = arith.constant 0 : i32
    %c0_i32_2 = arith.constant 0 : i32
    %c0_i32_3 = arith.constant 0 : i32
    return %c0_i32, %c0_i32_0, %c0_i32_1, %c0_i32_2 : i32, i32, i32, i32
  }
  func.func @transform_2(%arg0: i32, %arg1: i32) -> (i32, i32, i32, i32) {
    %c0_i32 = arith.constant 0 : i32
    %c0_i32_0 = arith.constant 0 : i32
    %c0_i32_1 = arith.constant 0 : i32
    %c0_i32_2 = arith.constant 0 : i32
    %c0_i32_3 = arith.constant 0 : i32
    return %c0_i32, %c0_i32_0, %c0_i32_1, %c0_i32_2 : i32, i32, i32, i32
  }
  func.func @transform_3(%arg0: i32, %arg1: i32) -> (i32, i32, i32, i32) {
    %c0_i32 = arith.constant 0 : i32
    %c0_i32_0 = arith.constant 0 : i32
    %c0_i32_1 = arith.constant 0 : i32
    return %arg0, %c0_i32, %arg1, %c0_i32_0 : i32, i32, i32, i32
  }
}

</mosaic_0001>

<bundles_post_ra>
// kernel: tpu_custom_call.1
= control target key start
LH: loop header
LB: loop body
LE: loop exit
PB: predicated region body
PF: predicated region fallthrough
CT: control target
= control target key end

     0   :  { %8 = vsyncpa [#allocation3], 0  ;;  %s891_s0 = inlined_call_operand.hbm [shape: f32[2,4,2,128], index: 0, kind: input, shape index: {}]   ;;  %s892_s1 = inlined_call_operand.vmem [shape: f32[1,4,1,1], index: 1, kind: input, shape index: {}]   ;;  %s893_s2 = inlined_call_operand.vmem [shape: f32[1,4,1,1], index: 2, kind: input, shape index: {}]   ;;  %s894_s3 = inlined_call_operand.hbm [shape: f32[2,4,2,128], index: 3, kind: output, shape index: {}]  }
   0x1   :  { %10 = vsyncpa [#allocation3 + $0x1], 0 }
   0x2   :  { %11 = vsyncpa [#allocation4], 0 }
   0x3   :  { %13 = vsyncpa [#allocation4 + $0x1], 0  ;;  %s680_s12 = smov 0   ;;  %s682_s13 = smov 0  }
   0x4   :  { %s684_s14 = smov 0   ;;  %s686_s15 = smov 0  }
   0x5   :  { %s688_s16 = smov 0   ;;  %s690_s17 = smov 0  }
   0x6 LB: > { %s441_s18 = sadd.s32 4294967295, %s651_s17   ;;  %s442_s19 = sadd.s32 4294967294, %s651_s17   ;;  %s651_s17 = sphi %s690_s17, %s19_s17   ;;  %s647_s16 = sphi %s688_s16, %s909_s16   ;;  %s643_s15 = sphi %s686_s15, %s908_s15   ;;  %s639_s14 = sphi %s684_s14, %s907_s14   ;;  %s635_s13 = sphi %s682_s13, %s906_s13   ;;  %s631_s12 = sphi %s680_s12, %s905_s12  }
   0x7   : > { %s31_s20 = sadd.s32 1, %s647_s16  ;;  %s40_s21 = sadd.s32 1, %s639_s14 }
   0x8   : > { %p33_p0 = scmp.ge.s32.totalorder %s31_s20, 2  ;;  %p47_p1 = scmp.ne.s32.totalorder %s639_s14, %s635_s13 }
   0x9   : > { %p48_p2 = scmp.eq.s32.totalorder %s651_s17, 0  ;;  %p53_p3 = scmp.ne.s32.totalorder %s635_s13, %s631_s12 }
   0xa   : > { %s911_s20 = smov (%p33_p0, %s31_s20), 0  ;;  %p54_p5 = scmp.eq.s32.totalorder %s441_s18, 0 }
   0xb   : > { %p721_p4 = por %p48_p2, %p47_p1  ;;  %s35_s23 = ssub.s32 %s647_s16, %s911_s20 }
   0xc   : > { %p121_p6 = scmp.eq.s32.totalorder %s441_s18, 1  ;;  %p38_p7 = scmp.eq.s32.totalorder %s35_s23, 0 }
   0xd   : > { %p727_p8 = por %p54_p5, %p53_p3  ;;  %p127_p10 = scmp.eq.s32.totalorder %s442_s19, 1 }
   0xe   : > { %p731_p9 = por %p121_p6, %p47_p1  ;;  %p478_p13 = scmp.lt.s32.totalorder %s651_s17, 2 }
   0xf   : > { %s736_s26 = scalar_select %p38_p7, %s639_s14, %s40_s21  }
  0x10   : > { %s898_s25 = scalar_select %p731_p9, 1, 0 }
  0x11   : > { %p738_p11 = por %p127_p10, %p53_p3  ;;  %s153_s28 = sand.u32 1, %s639_s14  }
  0x12   : > { %s445_s29 = sshll.u32 %s153_s28, 3  ;;  %s464_s30 = sshll.u32 %s647_s16, 7 }
  0x13   : > { %s899_s27 = scalar_select %p738_p11, 1, 0 }
  0x14   : > { %s749_s6 = scalar_lea.hbm %s891_s0, %s464_s30  ;;  %s157_s7 = scalar_lea.vmem [#allocation2], %s445_s29 }
  0x15   : > { %s165_s8 = sshll.u32 %s157_s7, 4  ;;  %p755_p0 = pnand %p478_p13, %p721_p4  ;;  %s751_s8 = int_to_ptr.vmem [resolvable:$true] %s165_s8 }
  0x16   : > { %s760_s10 = scalar_lea.sflag [#allocation3], %s153_s28  ;;  %s539_s11 = scalar_lea.hbm %s749_s6, 128 }
  0x17   : > { %p540_p2 = scmp.ne.s32.totalorder %s749_s6, %s539_s11  ;;  %p541_p3 = pneg %p755_p0 }
  0x18   : > { %s544_s21 = scalar_lea.hbm %s891_s0, 256  ;;  %p545_p4 = scmp.lt.u32.totalorder %s749_s6, %s891_s0 }
  0x19   : > { %p542_p5 = pnand %p541_p3, %p540_p2  ;;  %p546_p7 = scmp.lt.u32.totalorder %s544_s21, %s539_s11 }
  0x1a   : > { %p548_p13 = scmp.lt.u32.totalorder %s539_s11, %s749_s6 }
  0x1b   : > { %p543_p6 = pneg %p542_p5  ;;  %p547_p10 = por %p546_p7, %p545_p4 }
  0x1d   : > { %p549_p12 = por %p548_p13, %p547_p10 }
  0x1f   : > { %p550_p1 = pnand %p549_p12, %p543_p6 }
  0x21   : > { %553 = shalt.err (!%p550_p1)
}
  0x22   : > { %s554_s28 = scalar_lea.vmem %s751_s8, 128  ;;  %s653_s29 = smov [#allocation2]  }
  0x23   : > { %p555_p2 = scmp.ne.s32.totalorder %s751_s8, %s554_s28  ;;  %s559_s30 = sshll.u32 %s653_s29, 4  ;;  %s560_s30 = int_to_ptr.vmem [resolvable:$false] %s559_s30 }
  0x24   : > { %s561_s4 = scalar_lea.vmem %s560_s30, 256  ;;  %p562_p9 = scmp.lt.s32.totalorder %s751_s8, %s560_s30 }
  0x25   : > { %p557_p5 = pnand %p555_p2, %p541_p3  ;;  %p563_p4 = scmp.lt.s32.totalorder %s561_s4, %s554_s28 }
  0x27   : > { %p558_p11 = pneg %p557_p5  ;;  %p564_p7 = por %p563_p4, %p562_p9 }
  0x29   : > { %p565_p10 = pnand %p564_p7, %p558_p11 }
  0x2b   : > { %568 = shalt.err (!%p565_p10)
}
  0x2c   : > { %s654_s5 = smov 32   ;;  %s655_s7 = smov 2  }
  0x2d   : > { %473 = dma.hbm_to_vmem [thread:$0]  (!%p755_p0), %s749_s6, 128, %s751_s8, %s760_s10, %s654_s5, %s654_s5, %s655_s7  }
  0x2e   : > { %p173_p12 = scmp.lt.s32.totalorder %s651_s17, 3  ;;  %p901_p1 = scmp.ge.s32.totalorder %s651_s17, 1 }
  0x30   : > { %p174_p3 = pnand %p901_p1, %p173_p12 }
  0x31   : > { %s792_s11 = sand.u32 (!%p174_p3), 1, %s635_s13  }
  0x32   : > { %177 = sbr.rel (%p174_p3) target bundleno = 217 (0xd9), region = 32  ;;  %s449_s18 = sshll.u32 (!%p174_p3), %s792_s11, 3 }
  0x33   : > { %s180_s19 = scalar_lea.sflag (!%p174_p3), [#allocation3], %s792_s11  ;;  %s183_s21 = scalar_lea.vmem (!%p174_p3), [#allocation2], %s449_s18 }
  0x39   : > { %622 = dma.done.wait (%p727_p8), %s180_s19, 128  }
  0x3a   : > { %624 = vsyncadd (%p727_p8), %s180_s19, 4294967168  ;;  %v656_v0 = vmov 0   ;;  %v453_v1 = vld [vmem:[%s892_s1 + $0x2] ss:$0 sm:$0xff]  ;;  %v451_v2 = vld [vmem:[%s892_s1] ss:$0 sm:$0xff] }
  0x3b   : > { %534 = vset.pattern.permute.xlu1 %v656_v0  ;;  %533 = vset.pattern.permute.xlu0 %v656_v0  ;;  %v454_v3 = vld [vmem:[%s892_s1 + $0x3] ss:$0 sm:$0xff]  ;;  %v452_v4 = vld [vmem:[%s892_s1 + $0x1] ss:$0 sm:$0xff]  ;;  %v455_v6 = vld [vmem:[%s893_s2] ss:$0 sm:$0xff] }
  0x3c   : > { %286 = vperm.xlu1 %534, %v453_v1   ;;  %278 = vperm.xlu0 %533, %v451_v2   ;;  %v456_v5 = vld [vmem:[%s893_s2 + $0x1] ss:$0 sm:$0xff]  ;;  %v458_v7 = vld [vmem:[%s893_s2 + $0x3] ss:$0 sm:$0xff]  ;;  %v457_v8 = vld [vmem:[%s893_s2 + $0x2] ss:$0 sm:$0xff] }
  0x3d   : > { %vm210_vm0 = vcmask 1041408   ;;  %v206_v9 = vld [vmem:[%s183_s21] sm:$0x3]  ;;  %v207_v10 = vld [vmem:[%s183_s21 + $0x2] sm:$0x3]  ;;  %s465_s10 = sshll.u32 %s643_s15, 7 }
  0x3e   : > { %v211_v11 = vsel %vm210_vm0, %v206_v9, 0.0  ;;  %v212_v12 = vsel %vm210_vm0, %v207_v10, 0.0  ;;  %v208_v13 = vld [vmem:[%s183_s21 + $0x4] sm:$0x3]  ;;  %v209_v16 = vld [vmem:[%s183_s21 + $0x6] sm:$0x3]  ;;  %s842_s23 = scalar_lea.hbm %s894_s3, %s465_s10 }
  0x3f   : > { %v213_v14 = vadd.f32 %v212_v12, %v211_v11  ;;  %v214_v15 = vsel %vm210_vm0, %v208_v13, 0.0  ;;  %v216_v18 = vsel %vm210_vm0, %v209_v16, 0.0  ;;  %s205_s21 = scalar_lea.vmem [#allocation5], %s449_s18  ;;  %s342_s15 = scalar_lea.sflag [#allocation4], %s792_s11 }
  0x40   : > { %290 = vperm.xlu1 %534, %v454_v3   ;;  %282 = vperm.xlu0 %533, %v452_v4   ;;  %s356_s9 = sshll.u32 %s205_s21, 4  ;;  %p902_p9 = scmp.ne.s32.totalorder %s898_s25, 0  ;;  %s837_s9 = int_to_ptr.vmem [resolvable:$true] %s356_s9 }
  0x41   : > { %v215_v17 = vadd.f32 %v214_v15, %v213_v14  ;;  %s569_s28 = scalar_lea.vmem %s837_s9, 128  ;;  %s657_s24 = smov [#allocation5]  }
  0x42   : > { %p570_p8 = scmp.ne.s32.totalorder %s837_s9, %s569_s28  ;;  %s573_s29 = sshll.u32 %s657_s24, 4  ;;  %s574_s29 = int_to_ptr.vmem [resolvable:$false] %s573_s29 }
  0x43   : > { %v217_v19 = vadd.f32 %v216_v18, %v215_v17  ;;  %s575_s30 = scalar_lea.vmem %s574_s29, 256  ;;  %p576_p6 = scmp.lt.s32.totalorder %s837_s9, %s574_s29 }
  0x44   : > { %322 = vperm.xlu1 %534, %v456_v5   ;;  %318 = vperm.xlu0 %533, %v455_v6   ;;  %p571_p11 = pnand %p570_p8, %p902_p9  ;;  %p577_p13 = scmp.lt.s32.totalorder %s575_s30, %s569_s28 }
  0x45   : > { %v218_v20 = vmul.f32 0.25, %v217_v19 }
  0x46   : > { %p572_p0 = pneg %p571_p11  ;;  %p578_p2 = por %p577_p13, %p576_p6 }
  0x47   : > { %v219_v21 = vsub.f32 %v206_v9, %v218_v20  ;;  %v220_v22 = vsub.f32 %v207_v10, %v218_v20  ;;  %v221_v23 = vsub.f32 %v208_v13, %v218_v20  ;;  %v222_v26 = vsub.f32 %v209_v16, %v218_v20 }
  0x48   : > { %330 = vperm.xlu1 %534, %v458_v7   ;;  %326 = vperm.xlu0 %533, %v457_v8   ;;  %p579_p5 = pnand %p578_p2, %p572_p0 }
  0x49   : > { %v223_v24 = vmul.f32 %v219_v21, %v219_v21  ;;  %v224_v25 = vmul.f32 %v220_v22, %v220_v22  ;;  %v225_v27 = vmul.f32 %v221_v23, %v221_v23  ;;  %v226_v31 = vmul.f32 %v222_v26, %v222_v26 }
  0x4b   : > { %v227_v28 = vsel %vm210_vm0, %v223_v24, 0.0  ;;  %v228_v29 = vsel %vm210_vm0, %v224_v25, 0.0  ;;  %v230_v32 = vsel %vm210_vm0, %v225_v27, 0.0  ;;  %v232_v34 = vsel %vm210_vm0, %v226_v31, 0.0 }
  0x4c   : > { %v229_v30 = vadd.f32 %v228_v29, %v227_v28 }
  0x4e   : > { %v231_v33 = vadd.f32 %v230_v32, %v229_v30 }
  0x50   : > { %v233_v35 = vadd.f32 %v232_v34, %v231_v33 }
  0x52   : > { %v234_v36 = vmul.f32 0.25, %v233_v35 }
  0x54   : > { %535 = vrsqrt.f32 %v234_v36  ;;  %vm237_vm1 = vcmp.eq.f32.partialorder %v234_v36, inf  ;;  %v240_v39 = vand.u32 2147483648, %v234_v36  ;;  %vm239_vm2 = vcmp.eq.f32.partialorder %v234_v36, 0.0 }
  0x5e   : > { %v536_v37 = vpop.eup %535 }
  0x5f   : > { %v236_v38 = vmul.f32 %v536_v37, %v234_v36 }
  0x61   : > { %v238_v40 = vsel %vm237_vm1, %v234_v36, %v236_v38 }
  0x62   : > { %v241_v41 = vsel %vm239_vm2, %v240_v39, %v238_v40 }
  0x63   : > { %v242_v42 = vadd.f32 1e-05, %v241_v41 }
  0x65   : > { %537 = vrcp.f32 %v242_v42 }
  0x6f   : > { %v538_v43 = vpop.eup %537 }
  0x70   : > { %v253_v46 = vmul.f32 %v538_v43, %v219_v21  ;;  %v254_v47 = vmul.f32 %v538_v43, %v220_v22  ;;  %v255_v50 = vmul.f32 %v538_v43, %v221_v23  ;;  %v256_v52 = vmul.f32 %v538_v43, %v222_v26 }
  0xbb   : > { %v287_v44 = vpop.permute.xlu1 %286  ;;  %v279_v45 = vpop.permute.xlu0 %278 }
  0xbc   : > { %v293_v51 = vmul.f32 %v279_v45, %v253_v46  ;;  %v295_v58 = vmul.f32 %v287_v44, %v255_v50 }
  0xbf   : > { %v291_v48 = vpop.permute.xlu1 %290  ;;  %v283_v49 = vpop.permute.xlu0 %282 }
  0xc0   : > { %v294_v53 = vmul.f32 %v283_v49, %v254_v47  ;;  %v296_v59 = vmul.f32 %v291_v48, %v256_v52 }
  0xc3   : > { %v323_v54 = vpop.permute.xlu1 %322  ;;  %v319_v55 = vpop.permute.xlu0 %318 }
  0xc4   : > { %v334_v56 = vadd.f32 %v323_v54, %v294_v53  ;;  %v333_v57 = vadd.f32 %v319_v55, %v293_v51 }
  0xc6   : > { %338 = vst [vmem:[%s205_s21 + $0x2] sm:$0x3] %v334_v56  ;;  %337 = vst [vmem:[%s205_s21] sm:$0x3] %v333_v57 }
  0xc7   : > { %v331_v60 = vpop.permute.xlu1 %330  ;;  %v327_v61 = vpop.permute.xlu0 %326 }
  0xc8   : > { %v336_v62 = vadd.f32 %v331_v60, %v296_v59  ;;  %v335_v63 = vadd.f32 %v327_v61, %v295_v58 }
  0xca   : > { %340 = vst [vmem:[%s205_s21 + $0x6] sm:$0x3] %v336_v62  ;;  %339 = vst [vmem:[%s205_s21 + $0x4] sm:$0x3] %v335_v63 }
  0xcb   : > { %582 = shalt.err (!%p579_p5)
}
  0xcc   : > { %s583_s4 = scalar_lea.hbm %s842_s23, 128  ;;  %s587_s19 = scalar_lea.hbm %s894_s3, 256 }
  0xcd   : > { %p584_p4 = scmp.ne.s32.totalorder %s842_s23, %s583_s4  ;;  %p588_p12 = scmp.lt.u32.totalorder %s842_s23, %s894_s3 }
  0xce   : > { %p589_p1 = scmp.lt.u32.totalorder %s587_s19, %s583_s4  ;;  %p591_p8 = scmp.lt.u32.totalorder %s583_s4, %s842_s23 }
  0xcf   : > { %p585_p7 = pnand %p584_p4, %p902_p9 }
  0xd0   : > { %p590_p3 = por %p589_p1, %p588_p12 }
  0xd1   : > { %p586_p10 = pneg %p585_p7 }
  0xd2   : > { %p592_p11 = por %p591_p8, %p590_p3 }
  0xd4   : > { %p593_p0 = pnand %p592_p11, %p586_p10 }
  0xd6   : > { %596 = shalt.err (!%p593_p0)
}
  0xd7   : > { %s658_s21 = smov 32   ;;  %s659_s10 = smov 2  }
  0xd8   : > { %468 = dma.vmem_to_hbm [thread:$0]  (%p902_p9), %s837_s9, 128, %s842_s23, %s342_s15, %s658_s21, %s658_s21, %s659_s10  }
  0xd9 PF: > { %s371_s18 = sand.u32 1, %s631_s12   ;;  %p903_p6 = scmp.ne.s32.totalorder %s899_s27, 0 }
  0xda   : > { %p904_p13 = scmp.ge.s32.totalorder %s651_s17, 2  ;;  %s372_s22 = scalar_lea.sflag [#allocation4], %s371_s18 }
  0xdc   : > { %p475_p2 = pnand %p904_p13, %p903_p6 }
  0xde   : > { %626 = dma.done.wait (!%p475_p2), %s372_s22, 128  }
  0xdf   : > { %628 = vsyncadd (!%p475_p2), %s372_s22, 4294967168  ;;  %s19_s17 = sadd.s32 1, %s651_s17   ;;  %s905_s12 = smov %s635_s13 }
  0xe0   : > { %p16_p5 = scmp.ge.s32.totalorder %s19_s17, 4   ;;  %s906_s13 = smov %s639_s14 }
  0xe1   : > { %s907_s14 = smov %s736_s26  ;;  %s908_s15 = smov %s647_s16 }
  0xe2   : > { %s909_s16 = smov %s911_s20  ;;  %18 = sbr.rel (!%p16_p5) target bundleno = 6 (0x6), region = 77 }
  0xe9   :  { %377 = vsyncpa [#allocation3], 1 }
  0xea   :  { %379 = vsyncpa [#allocation3 + $0x1], 1 }
  0xeb   :  { %380 = vsyncpa [#allocation4], 1 }
  0xec   :  { %382 = vsyncpa [#allocation4 + $0x1], 1 }

</bundles_post_ra>
